<compile_context>
chip_gen: v6e
topology: v6e:2x2x1
jax: 0.10.0
libtpu: 0.0.40
codegen_flags: <defaults>
</compile_context>

<pallas_src>
import jax
import jax.numpy as jnp
from jax import lax
from jax.experimental import pallas as pl
from jax.experimental.pallas import tpu as pltpu


def _round_up(x, m):
    return ((x + m - 1) // m) * m


# ---------------------------------------------------------------------------
# Fused kernel: one-hot MXU gather of precomputed edge types
# ---------------------------------------------------------------------------
def _edge_embedding_kernel(etype_ref, planes_ref, out_ref):
    # etype_ref  : (TE, 1)  int32, precomputed edge types for this edge block
    # planes_ref : (3, edge_num, dim) bf16, table split into hi/mid/lo planes
    #              (hi + mid + lo == f32 table exactly; each plane uses one
    #               native DEFAULT-precision MXU pass instead of the 6 passes
    #               a HIGHEST-precision f32 matmul would need)
    # out_ref    : (TE, dim) edge features for this edge block
    etype = etype_ref[...]
    te = out_ref.shape[0]
    edge_num = planes_ref.shape[1]

    # One-hot gather via the MXU: (TE, edge_num) @ (edge_num, dim).
    # 0/1 is exact in bf16; each row has exactly one (or zero) matching column,
    # so every plane product is exact and accumulated in f32.
    # Rows with out-of-range types come out as zeros; padded tail edges map to
    # type 0 (the zero padding row) and are sliced off by the wrapper anyway.
    col = lax.broadcasted_iota(jnp.int32, (te, edge_num), 1)
    onehot = (col == etype).astype(jnp.bfloat16)

    acc = jnp.dot(onehot, planes_ref[0], preferred_element_type=jnp.float32)
    acc += jnp.dot(onehot, planes_ref[1], preferred_element_type=jnp.float32)
    acc += jnp.dot(onehot, planes_ref[2], preferred_element_type=jnp.float32)
    out_ref[...] = acc.astype(out_ref.dtype)


# ---------------------------------------------------------------------------
# Module-level wrapper (graph bookkeeping is plain JAX glue)
# ---------------------------------------------------------------------------
def edge_embedding_forward(node_type, src_idx, dst_idx, table, block_edges=1024):
    """EdgeEmbedding.forward: edge type from endpoint atom types -> embedding.

    node_type : (N,)  int   atomic numbers per node
    src_idx   : (E,)  int   source node index per edge
    dst_idx   : (E,)  int   destination node index per edge
    table     : (edge_num, dim) float embedding table (row 0 = padding row)
    """
    E = src_idx.shape[0]
    edge_num, dim = table.shape
    out_dtype = table.dtype

    # --- edge-type pairing: tiny (E,)-sized int math, left to XLA ------------
    # PyTorch writes (|x-y|-1)**2 / 4; nn.Embedding requires integer indices,
    # so this is the integer (floor-div) unordered pairing function.
    x = node_type[src_idx].astype(jnp.int32)
    y = node_type[dst_idx].astype(jnp.int32)
    d = jnp.abs(x - y) - 1
    etype = x * y + (d * d) // 4                      # (E,) int32

    # --- lane-dense dim guard (no-op for the default dim=128) ----------------
    dim_pad = _round_up(dim, 128)
    table_f32 = table.astype(jnp.float32)
    if dim_pad != dim:
        table_f32 = jnp.pad(table_f32, ((0, 0), (0, dim_pad - dim)))

    # --- exact 3-plane bf16 split of the f32 table (done once, wrapper side) -
    t_hi = table_f32.astype(jnp.bfloat16)
    r1 = table_f32 - t_hi.astype(jnp.float32)
    t_mid = r1.astype(jnp.bfloat16)
    r2 = r1 - t_mid.astype(jnp.float32)
    t_lo = r2.astype(jnp.bfloat16)
    planes = jnp.stack([t_hi, t_mid, t_lo])           # (3, edge_num, dim_pad)

    # --- edge blocking --------------------------------------------------------
    # Large TE so each step writes a big lane-dense tile (overhead-bound
    # otherwise); cap TE so the (TE, edge_num) one-hot intermediate stays a few
    # MiB of VMEM even for large type vocabularies (e.g. edge_num=3000).
    onehot_budget_bytes = 4 << 20
    te_cap = max(8, ((onehot_budget_bytes // (edge_num * 4)) // 8) * 8)
    te = min(block_edges, te_cap, _round_up(E, 8))
    te = _round_up(te, 8)
    e_pad = _round_up(E, te)
    # Padded tail edges get type 0 (-> zero padding row); sliced off below.
    etype = jnp.pad(etype, (0, e_pad - E)).reshape(e_pad, 1)

    out = pl.pallas_call(
        _edge_embedding_kernel,
        out_shape=jax.ShapeDtypeStruct((e_pad, dim_pad), out_dtype),
        grid_spec=pltpu.PrefetchScalarGridSpec(
            num_scalar_prefetch=0,
            grid=(e_pad // te,),
            in_specs=[
                # precomputed edge types, one lane-sparse column per block
                pl.BlockSpec((te, 1), lambda i: (i, 0)),
                # full table planes, constant index_map -> DMA'd once, resident
                pl.BlockSpec((3, edge_num, dim_pad), lambda i: (0, 0, 0)),
            ],
            out_specs=pl.BlockSpec((te, dim_pad), lambda i: (i, 0)),
        ),
        compiler_params=pltpu.CompilerParams(
            # Edge blocks are fully independent -> shard across v7x's 2 TCs.
            # (Call-site tip: batch several molecules' edge lists into one call
            #  so e_pad//te >= 2 and launch overhead is amortized.)
            dimension_semantics=("parallel",),
        ),
    )(etype, planes)
    return out[:E, :dim]


if __name__ == "__main__":
    key = jax.random.PRNGKey(0)
    dim = 128        # embedding dim (module default)
    edge_num = 64    # max edge types; must exceed (max atomic number)^2
    N = 6            # number of nodes (atoms)
    E = 40           # number of edges (not a multiple of the block -> exercises padding)

    k1, k2, k3, k4 = jax.random.split(key, 4)

    # nn.Embedding(edge_num, dim, padding_idx=0): N(0,1) init, row 0 zeroed.
    table = jax.random.normal(k1, (edge_num, dim), dtype=jnp.float32)
    table = table.at[0].set(0.0)

    node_type = jax.random.randint(k2, (N,), 1, 8, dtype=jnp.int32)  # atomic numbers 1..7
    src_idx = jax.random.randint(k3, (E,), 0, N, dtype=jnp.int32)
    dst_idx = jax.random.randint(k4, (E,), 0, N, dtype=jnp.int32)

    # Small block_edges here just to exercise a multi-step grid + tail padding.
    edge_f = edge_embedding_forward(node_type, src_idx, dst_idx, table,
                                    block_edges=16)
    edge_f = jax.block_until_ready(edge_f)

    # pure-JAX reference check
    x = node_type[src_idx].astype(jnp.int32)
    y = node_type[dst_idx].astype(jnp.int32)
    ref_types = x * y + ((jnp.abs(x - y) - 1) ** 2) // 4
    ref = table[ref_types]
    assert edge_f.shape == (E, dim)
    assert jnp.allclose(edge_f, ref, rtol=1e-6, atol=1e-6), "mismatch vs reference"

    # TODO(synk): padding_idx=0 gradient-zeroing (backward of nn.Embedding) is a
    # training-time behavior with no forward-pass equivalent here.
    print("KERNEL_OK")
</pallas_src>

<mosaic_0001>
module attributes {stable_mosaic.version = 11 : i64} {
  func.func @_edge_embedding_kernel(%arg0: i32, %arg1: memref<16x1xi32, #tpu.memory_space<vmem>>, %arg2: memref<3x64x128xbf16, #tpu.memory_space<vmem>>, %arg3: memref<16x128xf32, #tpu.memory_space<vmem>>) attributes {dimension_semantics = [#tpu.dimension_semantics<parallel>], iteration_bounds = array<i64: 3>, scalar_prefetch = 0 : i64, scratch_operands = 0 : i64, tpu.core_type = #tpu.core_type<tc>, window_params = [{transform_indices = @transform_0, window_bounds = array<i64: 16, 1>}, {pipeline_mode = #tpu.pipeline_mode<synchronous>, transform_indices = @transform_1, window_bounds = array<i64: 3, 64, 128>}, {transform_indices = @transform_2, window_bounds = array<i64: 16, 128>}]} {
    %c0 = arith.constant 0 : index
    %c0_0 = arith.constant 0 : index
    %0 = vector.load %arg1[%c0, %c0_0] : memref<16x1xi32, #tpu.memory_space<vmem>>, vector<16x1xi32>
    %1 = tpu.iota {dimensions = array<i32: 1>} : vector<16x64xi32>
    %2 = vector.broadcast %0 : vector<16x1xi32> to vector<16x64xi32>
    %3 = arith.cmpi eq, %1, %2 : vector<16x64xi32>
    %4 = arith.extui %3 : vector<16x64xi1> to vector<16x64xi32>
    %5 = arith.sitofp %4 : vector<16x64xi32> to vector<16x64xf32>
    %6 = arith.truncf %5 : vector<16x64xf32> to vector<16x64xbf16>
    %c0_1 = arith.constant 0 : index
    %c0_2 = arith.constant 0 : index
    %c0_3 = arith.constant 0 : index
    %7 = vector.load %arg2[%c0_1, %c0_2, %c0_3] : memref<3x64x128xbf16, #tpu.memory_space<vmem>>, vector<1x64x128xbf16>
    %8 = vector.shape_cast %7 : vector<1x64x128xbf16> to vector<64x128xbf16>
    %cst = arith.constant dense<0.000000e+00> : vector<16x128xf32>
    %9 = tpu.matmul %6, %8, %cst {dimension_numbers = #tpu.dot_dimension_numbers<[1], [0], [0], [1], [0, 0, 1, 1], [], []>} : vector<16x64xbf16>, vector<64x128xbf16>, vector<16x128xf32> -> vector<16x128xf32>
    %c1 = arith.constant 1 : index
    %c0_4 = arith.constant 0 : index
    %c0_5 = arith.constant 0 : index
    %10 = vector.load %arg2[%c1, %c0_4, %c0_5] : memref<3x64x128xbf16, #tpu.memory_space<vmem>>, vector<1x64x128xbf16>
    %11 = vector.shape_cast %10 : vector<1x64x128xbf16> to vector<64x128xbf16>
    %cst_6 = arith.constant dense<0.000000e+00> : vector<16x128xf32>
    %12 = tpu.matmul %6, %11, %cst_6 {dimension_numbers = #tpu.dot_dimension_numbers<[1], [0], [0], [1], [0, 0, 1, 1], [], []>} : vector<16x64xbf16>, vector<64x128xbf16>, vector<16x128xf32> -> vector<16x128xf32>
    %13 = arith.addf %9, %12 : vector<16x128xf32>
    %c2 = arith.constant 2 : index
    %c0_7 = arith.constant 0 : index
    %c0_8 = arith.constant 0 : index
    %14 = vector.load %arg2[%c2, %c0_7, %c0_8] : memref<3x64x128xbf16, #tpu.memory_space<vmem>>, vector<1x64x128xbf16>
    %15 = vector.shape_cast %14 : vector<1x64x128xbf16> to vector<64x128xbf16>
    %cst_9 = arith.constant dense<0.000000e+00> : vector<16x128xf32>
    %16 = tpu.matmul %6, %15, %cst_9 {dimension_numbers = #tpu.dot_dimension_numbers<[1], [0], [0], [1], [0, 0, 1, 1], [], []>} : vector<16x64xbf16>, vector<64x128xbf16>, vector<16x128xf32> -> vector<16x128xf32>
    %17 = arith.addf %13, %16 : vector<16x128xf32>
    %c0_10 = arith.constant 0 : index
    %c0_11 = arith.constant 0 : index
    %18 = vector.load %arg3[%c0_10, %c0_11] : memref<16x128xf32, #tpu.memory_space<vmem>>, vector<16x128xf32>
    tpu.vector_store %arg3[%c0_10, %c0_11], %17 {strides = array<i32>} : memref<16x128xf32, #tpu.memory_space<vmem>>, vector<16x128xf32>,
    return
  }
  func.func @transform_0(%arg0: i32) -> (i32, i32) {
    %c0_i32 = arith.constant 0 : i32
    %c0_i32_0 = arith.constant 0 : i32
    return %arg0, %c0_i32 : i32, i32
  }
  func.func @transform_1(%arg0: i32) -> (i32, i32, i32) {
    %c0_i32 = arith.constant 0 : i32
    %c0_i32_0 = arith.constant 0 : i32
    %c0_i32_1 = arith.constant 0 : i32
    %c0_i32_2 = arith.constant 0 : i32
    return %c0_i32, %c0_i32_0, %c0_i32_1 : i32, i32, i32
  }
  func.func @transform_2(%arg0: i32) -> (i32, i32) {
    %c0_i32 = arith.constant 0 : i32
    %c0_i32_0 = arith.constant 0 : i32
    return %arg0, %c0_i32 : i32, i32
  }
}

</mosaic_0001>

<bundles_post_ra>
// kernel: tpu_custom_call.1
= control target key start
LH: loop header
LB: loop body
LE: loop exit
PB: predicated region body
PF: predicated region fallthrough
CT: control target
= control target key end

     0   :  { %7 = vsyncpa [#allocation3], 0  ;;  %s889_s0 = inlined_call_operand.vmem [shape: s32[48,1], index: 0, kind: input, shape index: {}]   ;;  %s890_s1 = inlined_call_operand.hbm [shape: bf16[3,64,128], index: 1, kind: input, shape index: {}]   ;;  %s891_s2 = inlined_call_operand.hbm [shape: f32[48,128], index: 2, kind: output, shape index: {}]  }
   0x1   :  { %8 = vsyncpa [#allocation4], 0 }
   0x2   :  { %10 = vsyncpa [#allocation4 + $0x1], 0  ;;  %s764_s9 = smov 0   ;;  %s766_s10 = smov 0  }
   0x3   :  { %s768_s11 = smov 0   ;;  %s770_s12 = smov 0  }
   0x4 LB: > { %s785_s13 = sadd.s32 4294967295, %s738_s12   ;;  %s495_s14 = sadd.s32 4294967294, %s738_s12   ;;  %s738_s12 = sphi %s770_s12, %s899_s12   ;;  %s734_s11 = sphi %s768_s11, %s898_s11   ;;  %s730_s10 = sphi %s766_s10, %s897_s10   ;;  %s726_s9 = sphi %s764_s9, %s896_s9  }
   0x5   : > { %s789_s15 = sadd.s32 1, %s738_s12   ;;  %s70_s16 = sadd.s32 1, %s734_s11 }
   0x6   : > { %s67_s17 = ssub.s32 %s738_s12, %s789_s15  ;;  %p80_p0 = scmp.ne.s32.totalorder %s734_s11, %s730_s10 }
   0x7   : > { %p68_p1 = scmp.eq.s32.totalorder %s67_s17, 0  ;;  %p81_p2 = scmp.eq.s32.totalorder %s785_s13, 2 }
   0x8   : > { %p86_p3 = scmp.ne.s32.totalorder %s730_s10, %s726_s9  ;;  %p87_p4 = scmp.eq.s32.totalorder %s495_s14, 2 }
   0x9   : > { %s800_s18 = scalar_select %p68_p1, %s734_s11, %s70_s16  }
   0xa   : > { %p802_p5 = por %p81_p2, %p80_p0  ;;  %p806_p6 = por %p87_p4, %p86_p3 }
   0xb   : > { %p496_p7 = scmp.ge.s32.totalorder %s738_s12, 1  ;;  %p94_p8 = scmp.lt.s32.totalorder %s738_s12, 4 }
   0xc   : > { %s893_s20 = scalar_select %p806_p6, 1, 0 }
   0xd   : > { %p592_p9 = scmp.eq.s32.totalorder %s785_s13, 0  ;;  %p813_p10 = pnand %p496_p7, %p94_p8 }
   0xe   : > { %s740_s22 = smov [#allocation2]  }
   0xf   : > { %s106_s23 = sshll.u32 %s740_s22, 4  ;;  %p584_p11 = pneg %p813_p10  ;;  %s107_s23 = int_to_ptr.vmem [resolvable:$true] %s106_s23 }
  0x10   : > { %s659_s24 = scalar_lea.vmem %s107_s23, 1536  ;;  %p667_p3 = scmp.lt.s32.totalorder %s107_s23, %s107_s23 }
  0x11   : > { %p585_p12 = pnand %p592_p9, %p584_p11  ;;  %p660_p0 = scmp.ne.s32.totalorder %s107_s23, %s659_s24 }
  0x12   : > { %p668_p4 = scmp.lt.s32.totalorder %s659_s24, %s659_s24 }
  0x13   : > { %p650_p13 = pneg %p585_p12 }
  0x14   : > { %p669_p6 = por %p668_p4, %p667_p3 }
  0x15   : > { %p662_p1 = pnand %p660_p0, %p650_p13 }
  0x17   : > { %p663_p2 = pneg %p662_p1 }
  0x19   : > { %p670_p7 = pnand %p669_p6, %p663_p2 }
  0x1b   : > { %673 = shalt.err (!%p670_p7)
}
  0x1c   : > { %s741_s25 = smov 64   ;;  %s742_s26 = smov 4  }
  0x1d   : > { %587 = dma.hbm_to_vmem [thread:$0]  (!%p585_p12), %s890_s1, 1536, %s107_s23, [#allocation3], %s741_s25, %s741_s25, %s742_s26  }
  0x1e   : > { %131 = sbr.rel (%p813_p10) target bundleno = 404 (0x194), region = 28 }
  0x23   : > { %717 = dma.done.wait (%p592_p9), [#allocation3], 1536  }
  0x24   : > { %719 = vsyncadd (%p592_p9), [#allocation3], 4294965760  ;;  %s502_s29 = sshll.u32 %s785_s13, 1  ;;  %v743_v0 = vmov 0   ;;  %v744_v1 = vmov 0.0   ;;  %v636_v4 = vld [vmem:[#allocation2 + $0x38] sm:$0xff]   ;;  %v163_v12 = vlaneseq }
  0x25   : > { %635 = vset.pattern.permute.xlu0 %v743_v0  ;;  %p154_p6 = scmp.lt.s32.totalorder %s502_s29, 5  ;;  %542 = vmatprep.subr.bf16.mxu0 %v744_v1  ;;  %v637_v5 = vld [vmem:[#allocation2 + $0x18] sm:$0xff]   ;;  %v638_v6 = vld [vmem:[#allocation2 + $0x30] sm:$0xff]   ;;  %vm745_vm0 = vmmov 0   ;;  %v640_v8 = vld [vmem:[#allocation2 + $0x28] sm:$0xff]   ;;  %vm219_vm3 = vcmask 523264  }
  0x26   : > { %554 = vmatprep.subr.bf16.mxu1 %v744_v1  ;;  %543 = vmatpush3.bf16.msra.mxu0 %v636_v4  ;;  %v639_v7 = vld [vmem:[#allocation2 + $0x10] sm:$0xff]   ;;  %v641_v9 = vld [vmem:[#allocation2 + $0x8] sm:$0xff]   ;;  %v642_v10 = vld [vmem:[#allocation2 + $0x20] sm:$0xff]   ;;  %v164_v13 = vand.u32 127, %v163_v12  ;;  %s150_s6 = sand.u32 1, %s730_s10   ;;  %s526_s16 = sshll.u32 %s785_s13, 8 }
  0x27   : > { %s901_s29 = smov (!%p154_p6, %s502_s29), 5  ;;  %555 = vmatpush3.bf16.msra.mxu1 %v637_v5  ;;  %544 = vmatprep.subr.bf16.mxu0 %v744_v1  ;;  %v643_v11 = vld [vmem:[#allocation2] sm:$0xff]   ;;  %v644_v18 = vld [vmem:[#allocation2 + $0x58] sm:$0xff]   ;;  %v645_v20 = vld [vmem:[#allocation2 + $0x50] sm:$0xff]   ;;  %s501_s7 = sshll.u32 %s150_s6, 4 }
  0x28   : > { %s503_s30 = sshll.u32 %s901_s29, 3  ;;  %556 = vmatprep.subr.bf16.mxu1 %v744_v1  ;;  %550 = vmatprep.mubr.msk.bf16.mxu0 %vm745_vm0, %v744_v1  ;;  %v646_v21 = vld [vmem:[#allocation2 + $0x48] sm:$0xff]   ;;  %v647_v22 = vld [vmem:[#allocation2 + $0x40] sm:$0xff]   ;;  %s152_s8 = scalar_lea.vmem [#allocation5], %s501_s7 }
  0x29   : > { %s157_s5 = scalar_lea.vmem %s889_s0, %s503_s30  ;;  %562 = vmatprep.mubr.msk.bf16.mxu1 %vm745_vm0, %v744_v1  ;;  %s421_s14 = sshll.u32 %s152_s8, 4  ;;  %s842_s14 = int_to_ptr.vmem [resolvable:$true] %s421_s14 }
  0x2a   : > { %v161_v2 = vld [vmem:[%s157_s5] sm:$0xff]  ;;  %v162_v3 = vld [vmem:[%s157_s5 + $0x8] sm:$0xff]  ;;  %545 = vmatpush3.bf16.msra.mxu0 %v638_v6  ;;  %s847_s22 = scalar_lea.hbm %s891_s2, %s526_s16  ;;  %s849_s23 = scalar_lea.sflag [#allocation4], %s150_s6 }
  0x2b   : > { %166 = vperm.xlu0 %635, %v161_v2   ;;  %557 = vmatpush3.bf16.msra.mxu1 %v639_v7  ;;  %s674_s13 = scalar_lea.vmem %s842_s14, 256  ;;  %s746_s24 = smov [#allocation5]  }
  0x2c   : > { %546 = vmatprep.subr.bf16.mxu0 %v744_v1  ;;  %558 = vmatprep.subr.bf16.mxu1 %v744_v1  ;;  %p675_p8 = scmp.ne.s32.totalorder %s842_s14, %s674_s13  ;;  %s678_s25 = sshll.u32 %s746_s24, 4  ;;  %s679_s25 = int_to_ptr.vmem [resolvable:$false] %s678_s25 }
  0x2d   : > { %s680_s26 = scalar_lea.vmem %s679_s25, 512  ;;  %p681_p11 = scmp.lt.s32.totalorder %s842_s14, %s679_s25 }
  0x2e   : > { %547 = vmatpush3.bf16.msra.mxu0 %v640_v8  ;;  %p676_p9 = pnand %p675_p8, %p802_p5  ;;  %p682_p12 = scmp.lt.s32.totalorder %s680_s26, %s674_s13 }
  0x2f   : > { %169 = vperm.xlu0 %635, %v162_v3   ;;  %559 = vmatpush3.bf16.msra.mxu1 %v641_v9 }
  0x30   : > { %548 = vmatprep.subr.bf16.mxu0 %v744_v1  ;;  %560 = vmatprep.subr.bf16.mxu1 %v744_v1  ;;  %p677_p10 = pneg %p676_p9  ;;  %p683_p13 = por %p682_p12, %p681_p11 }
  0x32   : > { %549 = vmatpush3.bf16.msra.mxu0 %v642_v10  ;;  %p684_p0 = pnand %p683_p13, %p677_p10 }
  0x33   : > { %561 = vmatpush3.bf16.msra.mxu1 %v643_v11  ;;  %566 = vmatprep.subr.bf16.mxu0 %v744_v1 }
  0xa6   : > { %v167_v14 = vpop.permute.xlu0 %166 }
  0xa7   : > { %vm171_vm1 = vcmp.eq.s32.totalorder %v164_v13, %v167_v14 }
  0xa8   : > { %v504_v16 = vsel %vm171_vm1, 1.0, %v744_v1 }
  0xaa   : > { %v170_v15 = vpop.permute.xlu0 %169 }
  0xab   : > { %vm172_vm2 = vcmp.eq.s32.totalorder %v164_v13, %v170_v15 }
  0xac   : > { %v505_v17 = vsel %vm172_vm2, 1.0, %v744_v1 }
  0xad   : > { %v177_v19 = vpack.c.bf16 %v505_v17, %v504_v16 }
  0xaf   : > { %551 = vmatmul.mubr.msk.bf16.vlgmr.msra.gmra.mxu0 %vm219_vm3, %v177_v19  ;;  %563 = vmatmul.mubr.msk.bf16.vlgmr.msra.gmra.mxu1 %vm219_vm3, %v177_v19 }
  0xb0   : > { %567 = vmatpush3.bf16.msra.mxu0 %v644_v18  ;;  %574 = vmatprep.mubr.msk.bf16.mxu0 %vm745_vm0, %v744_v1 }
  0xb1   : > { %568 = vmatprep.subr.bf16.mxu0 %v744_v1 }
  0xb4   : > { %569 = vmatpush3.bf16.msra.mxu0 %v645_v20 }
  0xb5   : > { %570 = vmatprep.subr.bf16.mxu0 %v744_v1 }
  0xb8   : > { %571 = vmatpush3.bf16.msra.mxu0 %v646_v21 }
  0xb9   : > { %572 = vmatprep.subr.bf16.mxu0 %v744_v1 }
  0xbc   : > { %573 = vmatpush3.bf16.msra.mxu0 %v647_v22 }
  0xbf   : > { %575 = vmatmul.mubr.msk.bf16.vlgmr.msra.gmra.mxu0 %vm219_vm3, %v177_v19 }
 0x16f   : > { %v257_v23 = vpop.f32.mrf.mxu0  ;;  %v322_v24 = vpop.f32.mrf.mxu1 }
 0x170   : > { %v323_v31 = vadd.f32 %v322_v24, %v257_v23 }
 0x171   : > { %v552_v25 = vpop.f32.mrf.mxu0  ;;  %v564_v26 = vpop.f32.mrf.mxu1 }
 0x173   : > { %v260_v27 = vpop.f32.mrf.mxu0  ;;  %v325_v28 = vpop.f32.mrf.mxu1 }
 0x174   : > { %v326_v35 = vadd.f32 %v325_v28, %v260_v27 }
 0x175   : > { %v553_v29 = vpop.f32.mrf.mxu0  ;;  %v565_v30 = vpop.f32.mrf.mxu1 }
 0x17f   : > { %v396_v32 = vpop.f32.mrf.mxu0 }
 0x180   : > { %v403_v33 = vadd.f32 %v396_v32, %v323_v31 }
 0x181   : > { %v576_v34 = vpop.f32.mrf.mxu0 }
 0x182   : > { %405 = vst [vmem:[%s152_s8] sm:$0xff] %v403_v33 }
 0x183   : > { %v399_v36 = vpop.f32.mrf.mxu0 }
 0x184   : > { %v404_v37 = vadd.f32 %v399_v36, %v326_v35 }
 0x185   : > { %v577_v38 = vpop.f32.mrf.mxu0 }
 0x186   : > { %406 = vst [vmem:[%s152_s8 + $0x8] sm:$0xff] %v404_v37 }
 0x187   : > { %687 = shalt.err (!%p684_p0)
}
 0x188   : > { %s688_s27 = scalar_lea.hbm %s847_s22, 256  ;;  %s692_s30 = scalar_lea.hbm %s891_s2, 768 }
 0x189   : > { %p689_p1 = scmp.ne.s32.totalorder %s847_s22, %s688_s27  ;;  %p693_p4 = scmp.lt.s32.totalorder %s847_s22, %s891_s2 }
 0x18a   : > { %p694_p7 = scmp.lt.s32.totalorder %s692_s30, %s688_s27 }
 0x18b   : > { %p690_p2 = pnand %p689_p1, %p802_p5 }
 0x18c   : > { %p695_p6 = por %p694_p7, %p693_p4 }
 0x18d   : > { %p691_p3 = pneg %p690_p2 }
 0x18f   : > { %p696_p8 = pnand %p695_p6, %p691_p3 }
 0x191   : > { %699 = shalt.err (!%p696_p8)
}
 0x192   : > { %s747_s5 = smov 128   ;;  %s748_s6 = smov 8  }
 0x193   : > { %582 = dma.vmem_to_hbm [thread:$0]  (%p802_p5), %s842_s14, 256, %s847_s22, %s849_s23, %s747_s5, %s747_s5, %s748_s6  }
 0x194 PF: > { %p594_p9 = scmp.ge.s32.totalorder %s738_s12, 2  ;;  %s436_s7 = sand.u32 1, %s726_s9  }
 0x195   : > { %p895_p10 = scmp.ne.s32.totalorder %s893_s20, 0  ;;  %s437_s8 = scalar_lea.sflag [#allocation4], %s436_s7 }
 0x197   : > { %p589_p11 = pnand %p594_p9, %p895_p10 }
 0x199   : > { %p590_p12 = pneg %p589_p11 }
 0x19b   : > { %721 = dma.done.wait (%p590_p12), %s437_s8, 256  }
 0x19c   : > { %723 = vsyncadd (%p590_p12), %s437_s8, 4294967040  ;;  %p13_p13 = scmp.ge.s32.totalorder %s789_s15, 5   ;;  %s896_s9 = smov %s730_s10 }
 0x19d   : > { %s897_s10 = smov %s734_s11  ;;  %s898_s11 = smov %s800_s18 }
 0x19e   : > { %s899_s12 = smov %s789_s15  ;;  %15 = sbr.rel (!%p13_p13) target bundleno = 4 (0x4), region = 70 }
 0x1a3   :  { %442 = vsyncpa [#allocation3], 1 }
 0x1a4   :  { %444 = vsyncpa [#allocation3 + $0x1], 1 }
 0x1a5   :  { %445 = vsyncpa [#allocation4], 1 }
 0x1a6   :  { %447 = vsyncpa [#allocation4 + $0x1], 1 }

</bundles_post_ra>
